<compile_context>
chip_gen: v5e
topology: v5e:2x2
jax: 0.10.0
libtpu: 0.0.40
codegen_flags: <defaults>
</compile_context>

<pallas_src>
import functools

import jax
import jax.numpy as jnp
from jax.experimental import pallas as pl
from jax.experimental.pallas import tpu as pltpu


def _round_up(x: int, m: int) -> int:
    return (x + m - 1) // m * m


def _linear_kernel_acc(x_ref, w_ref, b_ref, o_ref, acc_ref):
    # x_ref: (tm, tk), w_ref: (tk, tn), b_ref: (1, tn), o_ref: (tm, tn)
    k = pl.program_id(2)

    @pl.when(k == 0)
    def _init():
        acc_ref[...] = jnp.zeros_like(acc_ref)

    acc_ref[...] += jnp.dot(
        x_ref[...], w_ref[...], preferred_element_type=jnp.float32
    )

    @pl.when(k == pl.num_programs(2) - 1)
    def _finalize():
        o_ref[...] = (acc_ref[...] + b_ref[...]).astype(o_ref.dtype)


def _linear_kernel_single_k(x_ref, w_ref, b_ref, o_ref):
    # Whole K fits in one tile: no accumulator scratch, no branches.
    o_ref[...] = (
        jnp.dot(x_ref[...], w_ref[...], preferred_element_type=jnp.float32)
        + b_ref[...]
    ).astype(o_ref.dtype)


@jax.jit
def linear_pallas(x2d, w, b):
    """x2d: (B, K) f32, w: (K, N) f32, b: (N,) f32 -> (B, N) f32."""
    B, K = x2d.shape
    N = w.shape[1]

    # Sublane-aligned M tile, lane-aligned (multiple of 128) K and N tiles.
    tm = min(512, _round_up(B, 8))
    tk = min(512, _round_up(K, 128))
    tn = min(512, _round_up(N, 128))

    Bp = _round_up(B, tm)
    Kp = _round_up(K, tk)
    Np = _round_up(N, tn)

    # Zero-pad to tile multiples (zeros contribute nothing to the matmul; padded
    # rows/cols are sliced away below). Gives full-lane, unmasked output stores.
    xp = jnp.pad(x2d, ((0, Bp - B), (0, Kp - K)))
    wp = jnp.pad(w, ((0, Kp - K), (0, Np - N)))
    bp = jnp.pad(b, (0, Np - N)).reshape(1, Np)

    m_tiles, n_tiles, k_tiles = Bp // tm, Np // tn, Kp // tk

    flops = 2 * Bp * Kp * Np
    bytes_accessed = 4 * (Bp * Kp + Kp * Np + Bp * Np + Np)
    cost = pl.CostEstimate(
        flops=flops, transcendentals=0, bytes_accessed=bytes_accessed
    )
    cparams_kwargs = dict(vmem_limit_bytes=48 * 1024 * 1024)

    if k_tiles == 1:
        # Single-K-tile fast path: 2-D grid, no scratch accumulator.
        out_p = pl.pallas_call(
            _linear_kernel_single_k,
            out_shape=jax.ShapeDtypeStruct((Bp, Np), x2d.dtype),
            grid_spec=pl.GridSpec(
                grid=(m_tiles, n_tiles),
                in_specs=[
                    pl.BlockSpec((tm, Kp), lambda i, j: (i, 0)),  # activations
                    pl.BlockSpec((Kp, tn), lambda i, j: (0, j)),  # weight
                    pl.BlockSpec((1, tn), lambda i, j: (0, j)),   # bias
                ],
                out_specs=pl.BlockSpec((tm, tn), lambda i, j: (i, j)),
            ),
            compiler_params=pltpu.CompilerParams(
                dimension_semantics=("parallel", "parallel"), **cparams_kwargs
            ),
            cost_estimate=cost,
        )(xp, wp, bp)
    else:
        out_p = pl.pallas_call(
            _linear_kernel_acc,
            out_shape=jax.ShapeDtypeStruct((Bp, Np), x2d.dtype),
            grid_spec=pl.GridSpec(
                grid=(m_tiles, n_tiles, k_tiles),
                in_specs=[
                    pl.BlockSpec((tm, tk), lambda i, j, k: (i, k)),  # activations
                    pl.BlockSpec((tk, tn), lambda i, j, k: (k, j)),  # weight
                    pl.BlockSpec((1, tn), lambda i, j, k: (0, j)),   # bias (N-resident)
                ],
                out_specs=pl.BlockSpec((tm, tn), lambda i, j, k: (i, j)),
                scratch_shapes=[pltpu.VMEM((tm, tn), jnp.float32)],
            ),
            compiler_params=pltpu.CompilerParams(
                dimension_semantics=("parallel", "parallel", "arbitrary"),
                **cparams_kwargs,
            ),
            cost_estimate=cost,
        )(xp, wp, bp)

    return out_p[:B, :N]


class LinearRegressionModel2D:
    """JAX/Pallas port of the PyTorch LinearRegressionModel2D."""

    def __init__(self, input_length, output_length, key):
        in_features = input_length * 2
        out_features = output_length * 2
        k_w, k_b = jax.random.split(key)
        # Mimic torch nn.Linear default init: U(-1/sqrt(in), 1/sqrt(in)).
        bound = 1.0 / jnp.sqrt(jnp.float32(in_features))
        # Weight stored transposed: (in_features, out_features).
        self.weight_t = jax.random.uniform(
            k_w, (in_features, out_features), jnp.float32, -bound, bound
        )
        self.bias = jax.random.uniform(
            k_b, (out_features,), jnp.float32, -bound, bound
        )
        self.output_length = output_length

    def __call__(self, x):
        batch_size = x.shape[0]
        x_flat = x.reshape(batch_size, -1)                      # (B, input_length*2)
        out = linear_pallas(x_flat, self.weight_t, self.bias)   # (B, output_length*2)
        return out.reshape(batch_size, -1, 2)                   # (B, output_length, 2)


if __name__ == "__main__":
    key = jax.random.PRNGKey(0)
    k_model, k_x = jax.random.split(key)

    input_length = 16
    output_length = 8
    batch = 2

    model = LinearRegressionModel2D(input_length, output_length, k_model)

    x = jax.random.normal(k_x, (batch, input_length, 2), dtype=jnp.float32)

    out = model(x)
    out = jax.block_until_ready(out)

    # Reference check in plain JAX.
    ref = (x.reshape(batch, -1) @ model.weight_t + model.bias).reshape(batch, -1, 2)
    assert out.shape == (batch, output_length, 2), out.shape
    assert jnp.allclose(out, ref, atol=1e-5, rtol=1e-5)

    print("KERNEL_OK")
</pallas_src>

<mosaic_0001>
module attributes {stable_mosaic.version = 11 : i64} {
  func.func @_linear_kernel_single_k(%arg0: i32, %arg1: i32, %arg2: memref<8x128xf32, #tpu.memory_space<vmem>>, %arg3: memref<128x128xf32, #tpu.memory_space<vmem>>, %arg4: memref<1x128xf32, #tpu.memory_space<vmem>>, %arg5: memref<8x128xf32, #tpu.memory_space<vmem>>) attributes {dimension_semantics = [#tpu.dimension_semantics<parallel>, #tpu.dimension_semantics<parallel>], iteration_bounds = array<i64: 1, 1>, scalar_prefetch = 0 : i64, scratch_operands = 0 : i64, tpu.core_type = #tpu.core_type<tc>, window_params = [{transform_indices = @transform_0, window_bounds = array<i64: 8, 128>}, {transform_indices = @transform_1, window_bounds = array<i64: 128, 128>}, {transform_indices = @transform_2, window_bounds = array<i64: 1, 128>}, {transform_indices = @transform_3, window_bounds = array<i64: 8, 128>}]} {
    %c0 = arith.constant 0 : index
    %c0_0 = arith.constant 0 : index
    %0 = vector.load %arg2[%c0, %c0_0] : memref<8x128xf32, #tpu.memory_space<vmem>>, vector<8x128xf32>
    %c0_1 = arith.constant 0 : index
    %c0_2 = arith.constant 0 : index
    %1 = vector.load %arg3[%c0_1, %c0_2] : memref<128x128xf32, #tpu.memory_space<vmem>>, vector<128x128xf32>
    %cst = arith.constant dense<0.000000e+00> : vector<8x128xf32>
    %2 = tpu.matmul %0, %1, %cst {dimension_numbers = #tpu.dot_dimension_numbers<[1], [0], [0], [1], [0, 0, 1, 1], [], []>} : vector<8x128xf32>, vector<128x128xf32>, vector<8x128xf32> -> vector<8x128xf32>
    %c0_3 = arith.constant 0 : index
    %c0_4 = arith.constant 0 : index
    %3 = vector.load %arg4[%c0_3, %c0_4] : memref<1x128xf32, #tpu.memory_space<vmem>>, vector<1x128xf32>
    %4 = vector.broadcast %3 : vector<1x128xf32> to vector<8x128xf32>
    %5 = arith.addf %2, %4 : vector<8x128xf32>
    %c0_5 = arith.constant 0 : index
    %c0_6 = arith.constant 0 : index
    %6 = vector.load %arg5[%c0_5, %c0_6] : memref<8x128xf32, #tpu.memory_space<vmem>>, vector<8x128xf32>
    tpu.vector_store %arg5[%c0_5, %c0_6], %5 {strides = array<i32>} : memref<8x128xf32, #tpu.memory_space<vmem>>, vector<8x128xf32>,
    return
  }
  func.func @transform_0(%arg0: i32, %arg1: i32) -> (i32, i32) {
    %c0_i32 = arith.constant 0 : i32
    %c0_i32_0 = arith.constant 0 : i32
    return %arg0, %c0_i32 : i32, i32
  }
  func.func @transform_1(%arg0: i32, %arg1: i32) -> (i32, i32) {
    %c0_i32 = arith.constant 0 : i32
    %c0_i32_0 = arith.constant 0 : i32
    return %c0_i32, %arg1 : i32, i32
  }
  func.func @transform_2(%arg0: i32, %arg1: i32) -> (i32, i32) {
    %c0_i32 = arith.constant 0 : i32
    %c0_i32_0 = arith.constant 0 : i32
    return %c0_i32, %arg1 : i32, i32
  }
  func.func @transform_3(%arg0: i32, %arg1: i32) -> (i32, i32) {
    %c0_i32 = arith.constant 0 : i32
    return %arg0, %arg1 : i32, i32
  }
}

</mosaic_0001>

<bundles_post_ra>
// kernel: linear_pallas.1
= control target key start
LH: loop header
LB: loop body
LE: loop exit
PB: predicated region body
PF: predicated region fallthrough
CT: control target
= control target key end

     0   :  { %s138_s1 = inlined_call_operand.vmem [shape: f32[128,128], index: 1, kind: input, shape index: {}]   ;;  %s139_s2 = inlined_call_operand.vmem [shape: f32[1,128], index: 2, kind: input, shape index: {}]   ;;  %s140_s0 = inlined_call_operand.vmem [shape: f32[8,128], index: 0, kind: input, shape index: {}]   ;;  %s141_s3 = inlined_call_operand.vmem [shape: f32[8,128], index: 3, kind: output, shape index: {}]  }
   0x1   :  { %v30_v0 = vld [vmem:[%s138_s1 + $0x78] sm:$0xff]  ;;  %v29_v1 = vld [vmem:[%s138_s1 + $0x70] sm:$0xff]  ;;  %v28_v2 = vld [vmem:[%s138_s1 + $0x68] sm:$0xff] }
   0x2   :  { %35 = vmatpush.msra.mxu0 %v30_v0  ;;  %v27_v3 = vld [vmem:[%s138_s1 + $0x60] sm:$0xff]  ;;  %v26_v4 = vld [vmem:[%s138_s1 + $0x58] sm:$0xff]  ;;  %v25_v5 = vld [vmem:[%s138_s1 + $0x50] sm:$0xff] }
   0x3   :  { %v24_v6 = vld [vmem:[%s138_s1 + $0x48] sm:$0xff]  ;;  %v23_v7 = vld [vmem:[%s138_s1 + $0x40] sm:$0xff]  ;;  %v22_v8 = vld [vmem:[%s138_s1 + $0x38] sm:$0xff] }
   0x4   :  { %36 = vmatpush.msra.mxu0 %v29_v1  ;;  %v21_v9 = vld [vmem:[%s138_s1 + $0x30] sm:$0xff]  ;;  %v20_v10 = vld [vmem:[%s138_s1 + $0x28] sm:$0xff]  ;;  %v19_v11 = vld [vmem:[%s138_s1 + $0x20] sm:$0xff] }
   0x5   :  { %v18_v12 = vld [vmem:[%s138_s1 + $0x18] sm:$0xff]  ;;  %v17_v13 = vld [vmem:[%s138_s1 + $0x10] sm:$0xff]  ;;  %v16_v14 = vld [vmem:[%s138_s1 + $0x8] sm:$0xff] }
   0x6   :  { %37 = vmatpush.msra.mxu0 %v28_v2  ;;  %v15_v15 = vld [vmem:[%s138_s1] sm:$0xff] }
   0x7   :  { %v14_v16 = vld [vmem:[%s140_s0] sm:$0xff] }
   0x8   :  { %38 = vmatpush.msra.mxu0 %v27_v3  ;;  %v60_v17 = vld [vmem:[%s139_s2] ss:$0 sm:$0xff] }
   0xa   :  { %39 = vmatpush.msra.mxu0 %v26_v4 }
   0xc   :  { %40 = vmatpush.msra.mxu0 %v25_v5 }
   0xe   :  { %41 = vmatpush.msra.mxu0 %v24_v6 }
  0x10   :  { %42 = vmatpush.msra.mxu0 %v23_v7 }
  0x12   :  { %43 = vmatpush.msra.mxu0 %v22_v8 }
  0x14   :  { %44 = vmatpush.msra.mxu0 %v21_v9 }
  0x16   :  { %45 = vmatpush.msra.mxu0 %v20_v10 }
  0x18   :  { %46 = vmatpush.msra.mxu0 %v19_v11 }
  0x1a   :  { %47 = vmatpush.msra.mxu0 %v18_v12 }
  0x1c   :  { %48 = vmatpush.msra.mxu0 %v17_v13 }
  0x1e   :  { %49 = vmatpush.msra.mxu0 %v16_v14 }
  0x20   :  { %50 = vmatpush.msra.mxu0 %v15_v15 }
  0x21   :  { %51 = vmatmul.f32.vlgmr.msra.gmra.mxu0 %v14_v16 }
  0x9e   :  { %v52_v18 = vpop.f32.mrf.mxu0 }
  0x9f   :  { %v53_v19 = vadd.f32 %v60_v17, %v52_v18 }
  0xa1   :  { %55 = vst [vmem:[%s141_s3] sm:$0xff] %v53_v19 }

</bundles_post_ra>
